<compile_context>
chip_gen: v7x
topology: tpu7x:2x2x1
jax: 0.10.0
libtpu: 0.0.40
codegen_flags: <defaults>
</compile_context>

<pallas_src>
import functools

import jax
import jax.numpy as jnp
import numpy as np
from jax.experimental import pallas as pl
from jax.experimental.pallas import tpu as pltpu


def _assemble_kernel(n_ctx, emb_ref, ctx_ref, out_ref):
    # emb_ref: (N, L, D) frozen full token embedding (prefix at token 0,
    #          suffix at tokens 1+n_ctx:, placeholder tokens in between).
    # ctx_ref: (N, n_ctx, D) packed learnable context vectors.
    # out_ref: (N, L, D)
    # Dense full-tile copy, then overwrite only the n_ctx learnable token rows
    # (a small masked sublane store) — no sublane-axis concat/relayout.
    out_ref[...] = emb_ref[...]
    out_ref[:, pl.ds(1, n_ctx), :] = ctx_ref[...].astype(out_ref.dtype)


def assemble_prompts(token_embedding_full, ctx):
    """Pallas kernel: overwrite the ctx token rows of the frozen embedding."""
    N, L, D = token_embedding_full.shape
    n_ctx = ctx.shape[1]
    kernel = functools.partial(_assemble_kernel, n_ctx)
    itemsize = jnp.dtype(token_embedding_full.dtype).itemsize
    bytes_accessed = (2 * N * L * D + N * n_ctx * D) * itemsize
    return pl.pallas_call(
        kernel,
        out_shape=jax.ShapeDtypeStruct((N, L, D), token_embedding_full.dtype),
        # Whole-array, un-pipelined VMEM residency (no grid, no double-buffer).
        in_specs=[
            pl.BlockSpec(memory_space=pltpu.MemorySpace.VMEM),
            pl.BlockSpec(memory_space=pltpu.MemorySpace.VMEM),
        ],
        out_specs=pl.BlockSpec(memory_space=pltpu.MemorySpace.VMEM),
        cost_estimate=pl.CostEstimate(
            flops=0, transcendentals=0, bytes_accessed=bytes_accessed),
    )(token_embedding_full, ctx)


class CustomAnomalyCLIPPromptLearner:
    """JAX/Pallas re-implementation of Custom_AnomalyCLIP_PromptLearner.

    Parameters are initialized deterministically in-script (synthetic stand-ins
    for the CLIP token embeddings / tokenizer outputs).
    """

    def __init__(self, key, *, ctx_dim=128, context_length=16, prompt_length=4,
                 learnable_text_embedding_length=4,
                 learnable_text_embedding_depth=2, dtype=jnp.float32):
        self.n_cls = 1                      # ['object']
        self.normal_num = 1                 # ['{}']
        self.anomaly_num = 1                # ['damaged {}']
        self.anomaly_subtype_num = 5        # five anomaly subtype templates
        self.n_ctx = prompt_length
        self.L = context_length
        self.D = ctx_dim
        std = 0.02

        ks = jax.random.split(key, 12)

        # Learnable class-specific contexts (std=0.02 normal init), stored as
        # ONE packed (N, n_ctx, D) parameter so forward() needs no concat.
        n_pos = self.n_cls * self.normal_num
        n_neg = self.n_cls * self.anomaly_num
        n_sub = self.n_cls * self.anomaly_subtype_num
        self.N = n_pos + n_neg + n_sub
        self.ctx = std * jax.random.normal(
            ks[0], (self.N, self.n_ctx, ctx_dim), dtype)
        # Group views (mirrors of the module's three nn.Parameters).
        self.ctx_pos = self.ctx[:n_pos].reshape(
            self.n_cls, self.normal_num, self.n_ctx, ctx_dim)
        self.ctx_neg = self.ctx[n_pos:n_pos + n_neg].reshape(
            self.n_cls, self.anomaly_num, self.n_ctx, ctx_dim)
        self.ctx_anomaly_subtype = self.ctx[n_pos + n_neg:].reshape(
            self.n_cls, self.anomaly_subtype_num, self.n_ctx, ctx_dim)

        # Synthetic frozen token embeddings
        # (stand-in for clip_model.token_embedding(tokenize(...))).
        emb_pos = jax.random.normal(
            ks[3], (self.normal_num, self.n_cls, context_length, ctx_dim), dtype)
        emb_neg = jax.random.normal(
            ks[4], (self.anomaly_num, self.n_cls, context_length, ctx_dim), dtype)
        emb_sub = jax.random.normal(
            ks[5], (self.anomaly_subtype_num, self.n_cls, context_length, ctx_dim), dtype)
        emb_pos = jnp.transpose(emb_pos, (1, 0, 2, 3))   # (n_cls, num, L, D)
        emb_neg = jnp.transpose(emb_neg, (1, 0, 2, 3))
        emb_sub = jnp.transpose(emb_sub, (1, 0, 2, 3))

        # Mirrors of the module's registered prefix/suffix buffers (kept for
        # the reference check; the kernel consumes the full buffer below).
        self.token_prefix_pos = emb_pos[:, :, :1, :]
        self.token_suffix_pos = emb_pos[:, :, 1 + self.n_ctx:, :]
        self.token_prefix_neg = emb_neg[:, :, :1, :]
        self.token_suffix_neg = emb_neg[:, :, 1 + self.n_ctx:, :]
        self.token_prefix_anomaly_subtype = emb_sub[:, :, :1, :]
        self.token_suffix_anomaly_subtype = emb_sub[:, :, 1 + self.n_ctx:, :]

        def flat(x):  # (n_cls, num, ...) -> (n_cls*num, ...)
            return x.reshape((-1,) + x.shape[2:])

        # Precompute ONCE the flattened full frozen embedding (N, L, D):
        # prefix sits at token 0 and suffix at tokens 1+n_ctx:.  The kernel
        # only overwrites the ctx token rows at forward time.
        self.token_embedding_full = jnp.concatenate(
            [flat(emb_pos), flat(emb_neg), flat(emb_sub)], axis=0)

        # Synthetic deterministic tokenized prompts
        # (stand-in for the CLIP BPE tokenizer).  These are frozen, so the
        # flatten + concat is hoisted to __init__ as well.
        self.tokenized_prompts_pos = jax.random.randint(
            ks[6], (self.n_cls, self.normal_num, context_length), 0, 1000, jnp.int32)
        self.tokenized_prompts_neg = jax.random.randint(
            ks[7], (self.n_cls, self.anomaly_num, context_length), 0, 1000, jnp.int32)
        self.tokenized_prompts_anomaly_subtype = jax.random.randint(
            ks[8], (self.n_cls, self.anomaly_subtype_num, context_length), 0, 1000, jnp.int32)
        self.tokenized_prompts = jnp.concatenate(
            [self.tokenized_prompts_pos.reshape(-1, self.L),
             self.tokenized_prompts_neg.reshape(-1, self.L),
             self.tokenized_prompts_anomaly_subtype.reshape(-1, self.L)], axis=0)

        # Learnable compound text prompts (depth - 1 of them).
        self.compound_prompts_text = [
            std * jax.random.normal(
                ks[9 + i], (learnable_text_embedding_length, ctx_dim), dtype)
            for i in range(learnable_text_embedding_depth - 1)
        ]
        # TODO(synk): compound_prompt_projections (Linear ctx_dim->896) are created in
        # __init__ but never used in forward(), so they are omitted here.

    def __call__(self):
        # Per-call path: a single Pallas call that overwrites the ctx token
        # rows of the frozen (N, L, D) embedding.  No wrapper-side concats.
        prompts = assemble_prompts(self.token_embedding_full, self.ctx)
        return prompts, self.tokenized_prompts, self.compound_prompts_text


if __name__ == "__main__":
    key = jax.random.PRNGKey(0)
    # Small shapes consistent with the module: context_length=16 (real CLIP: 77),
    # ctx_dim=128 (real CLIP: 512/768), Prompt_length=4, embedding length/depth = 4/2.
    learner = CustomAnomalyCLIPPromptLearner(
        key, ctx_dim=128, context_length=16, prompt_length=4,
        learnable_text_embedding_length=4, learnable_text_embedding_depth=2)

    prompts, tokenized_prompts, compound_prompts_text = learner()
    prompts = jax.block_until_ready(prompts)
    tokenized_prompts = jax.block_until_ready(tokenized_prompts)

    # Expected shapes: (1 + 1 + 5, L, D) and (7, L)
    assert prompts.shape == (7, 16, 128), prompts.shape
    assert tokenized_prompts.shape == (7, 16), tokenized_prompts.shape
    assert len(compound_prompts_text) == 1
    assert compound_prompts_text[0].shape == (4, 128)

    # Pure-JAX reference for the token-axis assembly (mirrors torch.cat dims).
    def flat(x):
        return x.reshape((-1,) + x.shape[2:])
    ref_prefix = jnp.concatenate(
        [flat(learner.token_prefix_pos), flat(learner.token_prefix_neg),
         flat(learner.token_prefix_anomaly_subtype)], axis=0)
    ref_ctx = jnp.concatenate(
        [flat(learner.ctx_pos), flat(learner.ctx_neg),
         flat(learner.ctx_anomaly_subtype)], axis=0)
    ref_suffix = jnp.concatenate(
        [flat(learner.token_suffix_pos), flat(learner.token_suffix_neg),
         flat(learner.token_suffix_anomaly_subtype)], axis=0)
    ref_prompts = jnp.concatenate([ref_prefix, ref_ctx, ref_suffix], axis=1)
    np.testing.assert_allclose(np.asarray(prompts), np.asarray(ref_prompts),
                               rtol=0, atol=0)

    print("KERNEL_OK")
</pallas_src>

<mosaic_0001>
module attributes {stable_mosaic.version = 11 : i64} {
  func.func @_assemble_kernel(%arg0: memref<7x16x128xf32, #tpu.memory_space<vmem>>, %arg1: memref<7x4x128xf32, #tpu.memory_space<vmem>>, %arg2: memref<7x16x128xf32, #tpu.memory_space<vmem>>) attributes {dimension_semantics = [], scalar_prefetch = 0 : i64, scratch_operands = 0 : i64, tpu.core_type = #tpu.core_type<tc>} {
    %c0 = arith.constant 0 : index
    %c0_0 = arith.constant 0 : index
    %c0_1 = arith.constant 0 : index
    %0 = vector.load %arg0[%c0, %c0_0, %c0_1] : memref<7x16x128xf32, #tpu.memory_space<vmem>>, vector<7x16x128xf32>
    %c0_2 = arith.constant 0 : index
    %c0_3 = arith.constant 0 : index
    %c0_4 = arith.constant 0 : index
    %1 = vector.load %arg2[%c0_2, %c0_3, %c0_4] : memref<7x16x128xf32, #tpu.memory_space<vmem>>, vector<7x16x128xf32>
    tpu.vector_store %arg2[%c0_2, %c0_3, %c0_4], %0 {strides = array<i32>} : memref<7x16x128xf32, #tpu.memory_space<vmem>>, vector<7x16x128xf32>,
    %c0_5 = arith.constant 0 : index
    %c0_6 = arith.constant 0 : index
    %c0_7 = arith.constant 0 : index
    %2 = vector.load %arg1[%c0_5, %c0_6, %c0_7] : memref<7x4x128xf32, #tpu.memory_space<vmem>>, vector<7x4x128xf32>
    %c0_8 = arith.constant 0 : index
    %c1 = arith.constant 1 : index
    %c0_9 = arith.constant 0 : index
    %3 = vector.load %arg2[%c0_8, %c1, %c0_9] : memref<7x16x128xf32, #tpu.memory_space<vmem>>, vector<7x4x128xf32>
    tpu.vector_store %arg2[%c0_8, %c1, %c0_9], %2 {strides = array<i32>} : memref<7x16x128xf32, #tpu.memory_space<vmem>>, vector<7x4x128xf32>,
    return
  }
}

</mosaic_0001>

<bundles_post_ra>
// kernel: tpu_custom_call.1
= control target key start
LH: loop header
LB: loop body
LE: loop exit
PB: predicated region body
PF: predicated region fallthrough
CT: control target
= control target key end

     0   :  { %7 = vsyncpa [#allocation3], 0  ;;  %s243_s0 = inlined_call_operand.hbm [shape: f32[7,16,128], index: 0, kind: input, shape index: {}]   ;;  %s244_s1 = inlined_call_operand.hbm [shape: f32[7,4,128], index: 1, kind: input, shape index: {}]   ;;  %s245_s2 = inlined_call_operand.hbm [shape: f32[7,16,128], index: 2, kind: output, shape index: {}]  }
   0x1   :  { %8 = vsyncpa [#allocation6], 0 }
   0x2   :  { %9 = vsyncpa [#allocation4], 0  ;;  %s179_s9 = smov [#allocation2]   ;;  %s107_s13 = scalar_lea.hbm %s243_s0, 1792 }
   0x3   :  { %s15_s10 = sshll.u32 %s179_s9, 4  ;;  %p108_p0 = scmp.ne.s32.totalorder %s243_s0, %s107_s13  ;;  %s16_s10 = int_to_ptr.vmem [resolvable:$true] %s15_s10 }
   0x4   :  { %p111_p1 = scmp.lt.u32.totalorder %s107_s13, %s243_s0 }
   0x6   :  { %p113_p2 = pnand %p111_p1, %p108_p0 }
   0x8   :  { %116 = shalt.err (!%p113_p2)
}
   0x9   :  { %s117_s18 = scalar_lea.vmem %s16_s10, 1792  ;;  %p122_p4 = scmp.lt.s32.totalorder %s16_s10, %s16_s10 }
   0xa   :  { %p118_p3 = scmp.ne.s32.totalorder %s16_s10, %s117_s18  ;;  %p123_p5 = scmp.lt.s32.totalorder %s117_s18, %s117_s18 }
   0xc   :  { %p124_p6 = por %p123_p5, %p122_p4 }
   0xe   :  { %p125_p7 = pnand %p124_p6, %p118_p3 }
  0x10   :  { %128 = shalt.err (!%p125_p7)
}
  0x11   :  { %s180_s19 = smov 128   ;;  %s181_s20 = smov 8  }
  0x12   :  { %21 = dma.hbm_to_vmem [thread:$0]  %s243_s0, 1792, %s16_s10, [#allocation3], %s180_s19, %s180_s19, %s181_s20  }
  0x13   :  { %s182_s23 = smov [#allocation5]   ;;  %s129_s27 = scalar_lea.hbm %s244_s1, 448 }
  0x14   :  { %s27_s24 = sshll.u32 %s182_s23, 4  ;;  %p130_p8 = scmp.ne.s32.totalorder %s244_s1, %s129_s27  ;;  %s28_s24 = int_to_ptr.vmem [resolvable:$true] %s27_s24 }
  0x15   :  { %p133_p9 = scmp.lt.u32.totalorder %s129_s27, %s244_s1 }
  0x17   :  { %p135_p10 = pnand %p133_p9, %p130_p8 }
  0x19   :  { %138 = shalt.err (!%p135_p10)
}
  0x1a   :  { %s139_s4 = scalar_lea.vmem %s28_s24, 448  ;;  %p144_p12 = scmp.lt.s32.totalorder %s28_s24, %s28_s24 }
  0x1b   :  { %p140_p11 = scmp.ne.s32.totalorder %s28_s24, %s139_s4  ;;  %p145_p13 = scmp.lt.s32.totalorder %s139_s4, %s139_s4 }
  0x1d   :  { %p146_p0 = por %p145_p13, %p144_p12 }
  0x1f   :  { %p147_p1 = pnand %p146_p0, %p140_p11 }
  0x21   :  { %150 = shalt.err (!%p147_p1)
}
  0x22   :  { %s183_s0 = smov 64   ;;  %s184_s5 = smov 4  }
  0x23   :  { %33 = dma.hbm_to_vmem [thread:$0]  %s244_s1, 448, %s28_s24, [#allocation6], %s183_s0, %s183_s0, %s184_s5  }
  0x24   :  { %173 = dma.done.wait [#allocation3], 1792  }
  0x25   :  { %174 = vsyncadd [#allocation3], 4294965504 }
  0x26   :  { %175 = dma.done.wait [#allocation6], 448  }
  0x27   :  { %176 = vsyncadd [#allocation6], 4294966848  ;;  %v40_v0 = vld [vmem:[#allocation2] sm:$0xff]  ;;  %v42_v1 = vld [vmem:[#allocation2 + $0x10] sm:$0xff]  ;;  %s185_s1 = smov [#allocation7]  }
  0x28   :  { %v44_v2 = vld [vmem:[#allocation2 + $0x20] sm:$0xff]  ;;  %54 = vst [vmem:[#allocation7] sm:$0xff] %v40_v0  ;;  %56 = vst [vmem:[#allocation7 + $0x10] sm:$0xff] %v42_v1  ;;  %v46_v3 = vld [vmem:[#allocation2 + $0x30] sm:$0xff]  ;;  %s87_s8 = sshll.u32 %s185_s1, 4  ;;  %s88_s8 = int_to_ptr.vmem [resolvable:$true] %s87_s8 }
  0x29   :  { %58 = vst [vmem:[#allocation7 + $0x20] sm:$0xff] %v44_v2  ;;  %v48_v4 = vld [vmem:[#allocation2 + $0x40] sm:$0xff]  ;;  %v50_v5 = vld [vmem:[#allocation2 + $0x50] sm:$0xff]  ;;  %60 = vst [vmem:[#allocation7 + $0x30] sm:$0xff] %v46_v3  ;;  %s151_s9 = scalar_lea.vmem %s88_s8, 1792  ;;  %p156_p3 = scmp.lt.s32.totalorder %s88_s8, %s88_s8 }
  0x2a   :  { %62 = vst [vmem:[#allocation7 + $0x40] sm:$0xff] %v48_v4  ;;  %64 = vst [vmem:[#allocation7 + $0x50] sm:$0xff] %v50_v5  ;;  %v52_v6 = vld [vmem:[#allocation2 + $0x60] sm:$0xff]  ;;  %v41_v7 = vld [vmem:[#allocation2 + $0x8] sm:$0xff]  ;;  %p152_p2 = scmp.ne.s32.totalorder %s88_s8, %s151_s9  ;;  %p157_p4 = scmp.lt.s32.totalorder %s151_s9, %s151_s9 }
  0x2b   :  { %v43_v8 = vld [vmem:[#allocation2 + $0x18] sm:$0xff]  ;;  %66 = vst [vmem:[#allocation7 + $0x60] sm:$0xff] %v52_v6  ;;  %55 = vst [vmem:[#allocation7 + $0x8] sm:$0xff] %v41_v7  ;;  %v45_v9 = vld [vmem:[#allocation2 + $0x28] sm:$0xff] }
  0x2c   :  { %57 = vst [vmem:[#allocation7 + $0x18] sm:$0xff] %v43_v8  ;;  %v47_v10 = vld [vmem:[#allocation2 + $0x38] sm:$0xff]  ;;  %v49_v11 = vld [vmem:[#allocation2 + $0x48] sm:$0xff]  ;;  %59 = vst [vmem:[#allocation7 + $0x28] sm:$0xff] %v45_v9  ;;  %p158_p5 = por %p157_p4, %p156_p3 }
  0x2d   :  { %61 = vst [vmem:[#allocation7 + $0x38] sm:$0xff] %v47_v10  ;;  %63 = vst [vmem:[#allocation7 + $0x48] sm:$0xff] %v49_v11  ;;  %v51_v12 = vld [vmem:[#allocation2 + $0x58] sm:$0xff]  ;;  %v53_v13 = vld [vmem:[#allocation2 + $0x68] sm:$0xff] }
  0x2e   :  { %v68_v14 = vld [vmem:[#allocation5] sm:$0xf]  ;;  %65 = vst [vmem:[#allocation7 + $0x58] sm:$0xff] %v51_v12  ;;  %67 = vst [vmem:[#allocation7 + $0x68] sm:$0xff] %v53_v13  ;;  %v69_v15 = vld [vmem:[#allocation5 + $0x4] sm:$0xf]  ;;  %p159_p6 = pnand %p158_p5, %p152_p2 }
  0x2f   :  { %75 = vst [vmem:[#allocation7 + $0x1] sm:$0xf] %v68_v14  ;;  %v70_v16 = vld [vmem:[#allocation5 + $0x8] sm:$0xf]  ;;  %v71_v17 = vld [vmem:[#allocation5 + $0xc] sm:$0xf] }
  0x30   :  { %76 = vst [vmem:[#allocation7 + $0x11] sm:$0xf] %v69_v15  ;;  %77 = vst [vmem:[#allocation7 + $0x21] sm:$0xf] %v70_v16  ;;  %v72_v18 = vld [vmem:[#allocation5 + $0x10] sm:$0xf] }
  0x31   :  { %78 = vst [vmem:[#allocation7 + $0x31] sm:$0xf] %v71_v17  ;;  %v73_v19 = vld [vmem:[#allocation5 + $0x14] sm:$0xf]  ;;  %v74_v20 = vld [vmem:[#allocation5 + $0x18] sm:$0xf] }
  0x32   :  { %79 = vst [vmem:[#allocation7 + $0x41] sm:$0xf] %v72_v18  ;;  %80 = vst [vmem:[#allocation7 + $0x51] sm:$0xf] %v73_v19 }
  0x33   :  { %81 = vst [vmem:[#allocation7 + $0x61] sm:$0xf] %v74_v20 }
  0x34   :  { %162 = shalt.err (!%p159_p6)
}
  0x35   :  { %s163_s12 = scalar_lea.hbm %s245_s2, 1792 }
  0x36   :  { %p164_p7 = scmp.ne.s32.totalorder %s245_s2, %s163_s12  ;;  %p167_p8 = scmp.lt.u32.totalorder %s163_s12, %s245_s2 }
  0x38   :  { %p169_p9 = pnand %p167_p8, %p164_p7 }
  0x3a   :  { %172 = shalt.err (!%p169_p9)
}
  0x3b   :  { %93 = dma.vmem_to_hbm [thread:$0]  %s88_s8, 1792, %s245_s2, [#allocation4], %s180_s19, %s180_s19, %s181_s20  }
  0x3c   :  { %177 = dma.done.wait [#allocation4], 1792  }
  0x3d   :  { %178 = vsyncadd [#allocation4], 4294965504 }
  0x3e   :  { %97 = vsyncpa [#allocation3], 1 }
  0x3f   :  { %98 = vsyncpa [#allocation6], 1 }
  0x40   :  { %99 = vsyncpa [#allocation4], 1 }

</bundles_post_ra>
